<compile_context>
chip_gen: v6e
topology: v6e:2x2x1
jax: 0.10.0
libtpu: 0.0.40
codegen_flags: <defaults>
</compile_context>

<pallas_src>
import math
from dataclasses import dataclass
from functools import partial

import jax
import jax.numpy as jnp
from jax.experimental import pallas as pl
from jax.experimental.pallas import tpu as pltpu


# ----------------------------- helpers ----------------------------------------

def _gelu_tanh(x):
    # GELU(approximate='tanh'), computed in f32.
    c = math.sqrt(2.0 / math.pi)
    return 0.5 * x * (1.0 + jnp.tanh(c * (x + 0.044715 * x * x * x)))


def _layernorm(h, g, b):
    mean = jnp.mean(h, axis=-1, keepdims=True)
    var = jnp.mean((h - mean) ** 2, axis=-1, keepdims=True)
    return (h - mean) * jax.lax.rsqrt(var + 1e-5) * g + b


# ----------------------------- transformer-blocks kernel -----------------------
# grid = (B, n_layer): batch "parallel" (v7x megacore), layers "arbitrary".
# Per-layer weights streamed via BlockSpec; residual stream kept in VMEM scratch.

def _blocks_kernel(x_ref,
                   ln1g_ref, ln1b_ref, qkvw_ref, qkvb_ref,
                   projw_ref, projb_ref, ln2g_ref, ln2b_ref,
                   fcw_ref, fcb_ref, mpw_ref, mpb_ref,
                   lnfg_ref, lnfb_ref,
                   out_ref,
                   xres_ref,
                   *, n_head):
    l = pl.program_id(1)
    T, D = x_ref.shape
    hd = D // n_head
    scale = 1.0 / math.sqrt(hd)
    bf16 = jnp.bfloat16

    @pl.when(l == 0)
    def _():
        xres_ref[...] = x_ref[...]            # (re)load residual stream per batch block

    x = xres_ref[...]                         # (T, D) f32

    # ---- attention sub-block: LN1 -> QKV -> batched-head causal attn -> proj
    h = _layernorm(x, ln1g_ref[...], ln1b_ref[...])
    qkv = (jnp.dot(h.astype(bf16), qkvw_ref[...],
                   preferred_element_type=jnp.float32)
           + qkvb_ref[...])                   # (T, 3D) f32

    def split_heads(slab):                    # (T, D) -> (H, T, hd)
        return jnp.stack([slab[:, i * hd:(i + 1) * hd] for i in range(n_head)],
                         axis=0)

    q = split_heads(qkv[:, 0:D]).astype(bf16)
    k = split_heads(qkv[:, D:2 * D]).astype(bf16)
    v = split_heads(qkv[:, 2 * D:3 * D]).astype(bf16)

    # batched over heads (leading batch dim); K^T never materialized.
    s = jnp.einsum('hqd,hkd->hqk', q, k,
                   preferred_element_type=jnp.float32) * scale   # (H, T, T) f32

    row = jax.lax.broadcasted_iota(jnp.int32, (T, T), 0)
    col = jax.lax.broadcasted_iota(jnp.int32, (T, T), 1)
    s = jnp.where((row >= col)[None, :, :], s, -1e30)            # causal mask, f32

    m = jnp.max(s, axis=-1, keepdims=True)
    p = jnp.exp(s - m)
    p = p * pl.reciprocal(jnp.sum(p, axis=-1, keepdims=True), approx=True)

    o = jnp.einsum('hqk,hkd->hqd', p.astype(bf16), v,
                   preferred_element_type=jnp.float32)           # (H, T, hd) f32
    o = jnp.concatenate([o[i] for i in range(n_head)], axis=-1)  # (T, D), merge heads

    y = (jnp.dot(o.astype(bf16), projw_ref[...],                 # single K=D proj
                 preferred_element_type=jnp.float32)
         + projb_ref[...])
    x = x + y

    # ---- MLP sub-block: LN2 -> fc -> GELU(tanh) -> proj -> residual
    h = _layernorm(x, ln2g_ref[...], ln2b_ref[...])
    hmid = (jnp.dot(h.astype(bf16), fcw_ref[...],
                    preferred_element_type=jnp.float32)
            + fcb_ref[...])
    hmid = _gelu_tanh(hmid)
    x = x + (jnp.dot(hmid.astype(bf16), mpw_ref[...],
                     preferred_element_type=jnp.float32)
             + mpb_ref[...])

    xres_ref[...] = x

    @pl.when(l == pl.num_programs(1) - 1)
    def _():
        # fuse final LayerNorm here (once per batch block, not per vocab tile)
        out_ref[...] = _layernorm(x, lnfg_ref[...], lnfb_ref[...]).astype(out_ref.dtype)


# ----------------------------- lm_head kernel ----------------------------------
# grid = (row blocks, vocab blocks); wte streamed pre-transposed (D, V_pad) bf16,
# lane-dense (multiple-of-128) output blocks.

def _lm_head_kernel(x_ref, w_ref, o_ref):
    o_ref[...] = jnp.dot(x_ref[...].astype(jnp.bfloat16), w_ref[...],
                         preferred_element_type=jnp.float32)


# ----------------------------- model definition --------------------------------

@dataclass(frozen=True)
class Config:
    block_size: int = 16
    vocab_size: int = 64
    n_layer: int = 2
    n_head: int = 2
    n_embd: int = 32


def init_params(key, cfg):
    std = 0.02
    proj_std = 0.02 * (2 * cfg.n_layer) ** (-0.5)
    D, L = cfg.n_embd, cfg.n_layer
    k = jax.random.split(key, 6)
    params = {
        # tied embedding / lm_head weight: (vocab, D)
        "wte": std * jax.random.normal(k[0], (cfg.vocab_size, D), jnp.float32),
        "wpe": std * jax.random.normal(k[1], (cfg.block_size, D), jnp.float32),
        "ln_f_g": jnp.ones((1, D), jnp.float32),
        "ln_f_b": jnp.zeros((1, D), jnp.float32),
        # per-layer params stacked on a leading L axis; weights stored (in, out)
        "ln1_g": jnp.ones((L, 1, D), jnp.float32),
        "ln1_b": jnp.zeros((L, 1, D), jnp.float32),
        "ln2_g": jnp.ones((L, 1, D), jnp.float32),
        "ln2_b": jnp.zeros((L, 1, D), jnp.float32),
        "attn_qkv_w": std * jax.random.normal(k[2], (L, D, 3 * D), jnp.float32),
        "attn_qkv_b": jnp.zeros((L, 1, 3 * D), jnp.float32),
        "attn_proj_w": proj_std * jax.random.normal(k[3], (L, D, D), jnp.float32),
        "attn_proj_b": jnp.zeros((L, 1, D), jnp.float32),
        "mlp_fc_w": std * jax.random.normal(k[4], (L, D, 4 * D), jnp.float32),
        "mlp_fc_b": jnp.zeros((L, 1, 4 * D), jnp.float32),
        "mlp_proj_w": proj_std * jax.random.normal(k[5], (L, 4 * D, D), jnp.float32),
        "mlp_proj_b": jnp.zeros((L, 1, D), jnp.float32),
    }
    return params


def _nbytes(x):
    return x.size * jnp.dtype(x.dtype).itemsize


@partial(jax.jit, static_argnums=(2,))
def gpt_forward(params, idx, cfg):
    B, T = idx.shape
    assert T <= cfg.block_size
    D, V, L, H = cfg.n_embd, cfg.vocab_size, cfg.n_layer, cfg.n_head
    bf16 = jnp.bfloat16
    VMEM_LIMIT = 32 * 1024 * 1024

    # Embedding lookup (data-dependent gather) kept as XLA glue.
    tok_emb = params["wte"][idx]                       # (B, T, D)
    pos_emb = params["wpe"][:T]                        # (T, D)
    x0 = tok_emb + pos_emb[None, :, :]                 # (B, T, D) f32

    # Weights cast to bf16 once (halves weight DMA/VMEM); biases/LN stay f32.
    args = (x0,
            params["ln1_g"], params["ln1_b"],
            params["attn_qkv_w"].astype(bf16), params["attn_qkv_b"],
            params["attn_proj_w"].astype(bf16), params["attn_proj_b"],
            params["ln2_g"], params["ln2_b"],
            params["mlp_fc_w"].astype(bf16), params["mlp_fc_b"],
            params["mlp_proj_w"].astype(bf16), params["mlp_proj_b"],
            params["ln_f_g"], params["ln_f_b"])

    # --- kernel 1: transformer blocks + final LN ---------------------------------
    x_spec = pl.BlockSpec((None, T, D), lambda b, l: (b, 0, 0))
    per_layer = lambda arr: pl.BlockSpec((None,) + arr.shape[1:],
                                         lambda b, l: (l, 0, 0))
    lnf_spec = pl.BlockSpec((1, D), lambda b, l: (0, 0))

    in_specs = [x_spec,
                per_layer(args[1]), per_layer(args[2]),
                per_layer(args[3]), per_layer(args[4]),
                per_layer(args[5]), per_layer(args[6]),
                per_layer(args[7]), per_layer(args[8]),
                per_layer(args[9]), per_layer(args[10]),
                per_layer(args[11]), per_layer(args[12]),
                lnf_spec, lnf_spec]

    flops_a = B * L * (24 * T * D * D + 4 * T * T * D)
    transc_a = B * L * (H * T * T + 4 * T * D + 2 * T) + B * T
    bytes_a = sum(_nbytes(a) for a in args) + B * T * D * 4

    x_f = pl.pallas_call(
        partial(_blocks_kernel, n_head=H),
        out_shape=jax.ShapeDtypeStruct((B, T, D), jnp.float32),
        grid=(B, L),
        in_specs=in_specs,
        out_specs=pl.BlockSpec((None, T, D), lambda b, l: (b, 0, 0)),
        scratch_shapes=[pltpu.VMEM((T, D), jnp.float32)],
        compiler_params=pltpu.CompilerParams(
            dimension_semantics=("parallel", "arbitrary"),
            vmem_limit_bytes=VMEM_LIMIT),
        cost_estimate=pl.CostEstimate(flops=flops_a,
                                      transcendentals=transc_a,
                                      bytes_accessed=bytes_a),
    )(*args)

    # --- kernel 2: tied lm_head, lane-dense vocab tiles --------------------------
    BT = B * T
    V_pad = ((V + 127) // 128) * 128
    TN = 128
    TM = BT if BT <= 256 else 256
    assert BT % TM == 0

    xf = x_f.reshape(BT, D)
    # one-time HBM-side transpose + zero-pad of the tied embedding: (D, V_pad) bf16
    wte_t = jnp.pad(params["wte"].T.astype(bf16), ((0, 0), (0, V_pad - V)))

    flops_b = 2 * BT * D * V_pad
    bytes_b = _nbytes(xf) + _nbytes(wte_t) + BT * V_pad * 4

    logits_pad = pl.pallas_call(
        _lm_head_kernel,
        out_shape=jax.ShapeDtypeStruct((BT, V_pad), jnp.float32),
        grid=(BT // TM, V_pad // TN),
        in_specs=[pl.BlockSpec((TM, D), lambda i, j: (i, 0)),
                  pl.BlockSpec((D, TN), lambda i, j: (0, j))],
        out_specs=pl.BlockSpec((TM, TN), lambda i, j: (i, j)),
        compiler_params=pltpu.CompilerParams(
            dimension_semantics=("parallel", "parallel"),
            vmem_limit_bytes=VMEM_LIMIT),
        cost_estimate=pl.CostEstimate(flops=flops_b,
                                      transcendentals=0,
                                      bytes_accessed=bytes_b),
    )(xf, wte_t)

    logits = logits_pad[:, :V].reshape(B, T, V)
    loss = None  # targets=None path; cross-entropy not exercised here
    return logits, loss


# ----------------------------- main ---------------------------------------------

if __name__ == "__main__":
    cfg = Config()
    key = jax.random.PRNGKey(0)
    k_param, k_idx = jax.random.split(key)
    params = init_params(k_param, cfg)

    B, T = 2, 8
    idx = jax.random.randint(k_idx, (B, T), 0, cfg.vocab_size, dtype=jnp.int32)

    logits, loss = gpt_forward(params, idx, cfg)
    logits = jax.block_until_ready(logits)
    assert logits.shape == (B, T, cfg.vocab_size)
    assert bool(jnp.all(jnp.isfinite(logits)))
    print("KERNEL_OK")
</pallas_src>

<mosaic_0001>
module attributes {stable_mosaic.version = 11 : i64} {
  func.func @_lm_head_kernel(%arg0: i32, %arg1: i32, %arg2: memref<16x32xf32, #tpu.memory_space<vmem>>, %arg3: memref<32x128xbf16, #tpu.memory_space<vmem>>, %arg4: memref<16x128xf32, #tpu.memory_space<vmem>>) attributes {dimension_semantics = [#tpu.dimension_semantics<parallel>, #tpu.dimension_semantics<parallel>], iteration_bounds = array<i64: 1, 1>, scalar_prefetch = 0 : i64, scratch_operands = 0 : i64, tpu.core_type = #tpu.core_type<tc>, window_params = [{transform_indices = @transform_0, window_bounds = array<i64: 16, 32>}, {transform_indices = @transform_1, window_bounds = array<i64: 32, 128>}, {transform_indices = @transform_2, window_bounds = array<i64: 16, 128>}]} {
    %c0 = arith.constant 0 : index
    %c0_0 = arith.constant 0 : index
    %0 = vector.load %arg2[%c0, %c0_0] : memref<16x32xf32, #tpu.memory_space<vmem>>, vector<16x32xf32>
    %1 = arith.truncf %0 : vector<16x32xf32> to vector<16x32xbf16>
    %c0_1 = arith.constant 0 : index
    %c0_2 = arith.constant 0 : index
    %2 = vector.load %arg3[%c0_1, %c0_2] : memref<32x128xbf16, #tpu.memory_space<vmem>>, vector<32x128xbf16>
    %cst = arith.constant dense<0.000000e+00> : vector<16x128xf32>
    %3 = tpu.matmul %1, %2, %cst {dimension_numbers = #tpu.dot_dimension_numbers<[1], [0], [0], [1], [0, 0, 1, 1], [], []>} : vector<16x32xbf16>, vector<32x128xbf16>, vector<16x128xf32> -> vector<16x128xf32>
    %c0_3 = arith.constant 0 : index
    %c0_4 = arith.constant 0 : index
    %4 = vector.load %arg4[%c0_3, %c0_4] : memref<16x128xf32, #tpu.memory_space<vmem>>, vector<16x128xf32>
    tpu.vector_store %arg4[%c0_3, %c0_4], %3 {strides = array<i32>} : memref<16x128xf32, #tpu.memory_space<vmem>>, vector<16x128xf32>,
    return
  }
  func.func @transform_0(%arg0: i32, %arg1: i32) -> (i32, i32) {
    %c0_i32 = arith.constant 0 : i32
    %c0_i32_0 = arith.constant 0 : i32
    return %arg0, %c0_i32 : i32, i32
  }
  func.func @transform_1(%arg0: i32, %arg1: i32) -> (i32, i32) {
    %c0_i32 = arith.constant 0 : i32
    %c0_i32_0 = arith.constant 0 : i32
    return %c0_i32, %arg1 : i32, i32
  }
  func.func @transform_2(%arg0: i32, %arg1: i32) -> (i32, i32) {
    %c0_i32 = arith.constant 0 : i32
    return %arg0, %arg1 : i32, i32
  }
}

module attributes {stable_mosaic.version = 11 : i64} {
  func.func @_blocks_kernel(%arg0: i32, %arg1: i32, %arg2: memref<1x8x32xf32, #tpu.memory_space<vmem>>, %arg3: memref<1x1x32xf32, #tpu.memory_space<vmem>>, %arg4: memref<1x1x32xf32, #tpu.memory_space<vmem>>, %arg5: memref<1x32x96xbf16, #tpu.memory_space<vmem>>, %arg6: memref<1x1x96xf32, #tpu.memory_space<vmem>>, %arg7: memref<1x32x32xbf16, #tpu.memory_space<vmem>>, %arg8: memref<1x1x32xf32, #tpu.memory_space<vmem>>, %arg9: memref<1x1x32xf32, #tpu.memory_space<vmem>>, %arg10: memref<1x1x32xf32, #tpu.memory_space<vmem>>, %arg11: memref<1x32x128xbf16, #tpu.memory_space<vmem>>, %arg12: memref<1x1x128xf32, #tpu.memory_space<vmem>>, %arg13: memref<1x128x32xbf16, #tpu.memory_space<vmem>>, %arg14: memref<1x1x32xf32, #tpu.memory_space<vmem>>, %arg15: memref<1x32xf32, #tpu.memory_space<vmem>>, %arg16: memref<1x32xf32, #tpu.memory_space<vmem>>, %arg17: memref<1x8x32xf32, #tpu.memory_space<vmem>>, %arg18: memref<8x32xf32, #tpu.memory_space<vmem>>) attributes {dimension_semantics = [#tpu.dimension_semantics<parallel>, #tpu.dimension_semantics<arbitrary>], iteration_bounds = array<i64: 2, 2>, scalar_prefetch = 0 : i64, scratch_operands = 1 : i64, tpu.core_type = #tpu.core_type<tc>, window_params = [{transform_indices = @transform_0, window_bounds = array<i64: 1, 8, 32>}, {transform_indices = @transform_1, window_bounds = array<i64: 1, 1, 32>}, {transform_indices = @transform_2, window_bounds = array<i64: 1, 1, 32>}, {transform_indices = @transform_3, window_bounds = array<i64: 1, 32, 96>}, {transform_indices = @transform_4, window_bounds = array<i64: 1, 1, 96>}, {transform_indices = @transform_5, window_bounds = array<i64: 1, 32, 32>}, {transform_indices = @transform_6, window_bounds = array<i64: 1, 1, 32>}, {transform_indices = @transform_7, window_bounds = array<i64: 1, 1, 32>}, {transform_indices = @transform_8, window_bounds = array<i64: 1, 1, 32>}, {transform_indices = @transform_9, window_bounds = array<i64: 1, 32, 128>}, {transform_indices = @transform_10, window_bounds = array<i64: 1, 1, 128>}, {transform_indices = @transform_11, window_bounds = array<i64: 1, 128, 32>}, {transform_indices = @transform_12, window_bounds = array<i64: 1, 1, 32>}, {pipeline_mode = #tpu.pipeline_mode<synchronous>, transform_indices = @transform_13, window_bounds = array<i64: 1, 32>}, {pipeline_mode = #tpu.pipeline_mode<synchronous>, transform_indices = @transform_14, window_bounds = array<i64: 1, 32>}, {transform_indices = @transform_15, window_bounds = array<i64: 1, 8, 32>}]} {
    %c0_i32 = arith.constant 0 : i32
    %0 = arith.cmpi eq, %arg1, %c0_i32 : i32
    %1 = arith.extui %0 : i1 to i32
    %c0_i32_0 = arith.constant 0 : i32
    %2 = arith.cmpi ne, %1, %c0_i32_0 : i32
    scf.if %2 {
      %c0_64 = arith.constant 0 : index
      %c0_65 = arith.constant 0 : index
      %c0_66 = arith.constant 0 : index
      %156 = vector.load %arg2[%c0_64, %c0_65, %c0_66] : memref<1x8x32xf32, #tpu.memory_space<vmem>>, vector<1x8x32xf32>
      %157 = vector.shape_cast %156 : vector<1x8x32xf32> to vector<8x32xf32>
      %c0_67 = arith.constant 0 : index
      %c0_68 = arith.constant 0 : index
      %158 = vector.load %arg18[%c0_67, %c0_68] : memref<8x32xf32, #tpu.memory_space<vmem>>, vector<8x32xf32>
      tpu.vector_store %arg18[%c0_67, %c0_68], %157 {strides = array<i32>} : memref<8x32xf32, #tpu.memory_space<vmem>>, vector<8x32xf32>,
    } else {
    }
    %c0 = arith.constant 0 : index
    %c0_1 = arith.constant 0 : index
    %3 = vector.load %arg18[%c0, %c0_1] : memref<8x32xf32, #tpu.memory_space<vmem>>, vector<8x32xf32>
    %c0_2 = arith.constant 0 : index
    %c0_3 = arith.constant 0 : index
    %c0_4 = arith.constant 0 : index
    %4 = vector.load %arg3[%c0_2, %c0_3, %c0_4] : memref<1x1x32xf32, #tpu.memory_space<vmem>>, vector<1x1x32xf32>
    %5 = vector.shape_cast %4 : vector<1x1x32xf32> to vector<1x32xf32>
    %c0_5 = arith.constant 0 : index
    %c0_6 = arith.constant 0 : index
    %c0_7 = arith.constant 0 : index
    %6 = vector.load %arg4[%c0_5, %c0_6, %c0_7] : memref<1x1x32xf32, #tpu.memory_space<vmem>>, vector<1x1x32xf32>
    %7 = vector.shape_cast %6 : vector<1x1x32xf32> to vector<1x32xf32>
    %cst = arith.constant dense<0.000000e+00> : vector<8xf32>
    %8 = vector.multi_reduction <add>, %3, %cst [1] : vector<8x32xf32> to vector<8xf32>
    %9 = vector.shape_cast %8 : vector<8xf32> to vector<8x1xf32>
    %cst_8 = arith.constant 3.200000e+01 : f32
    %10 = vector.broadcast %cst_8 : f32 to vector<8x1xf32>
    %11 = arith.divf %9, %10 : vector<8x1xf32>
    %12 = vector.broadcast %11 : vector<8x1xf32> to vector<8x32xf32>
    %13 = arith.subf %3, %12 : vector<8x32xf32>
    %14 = arith.mulf %13, %13 : vector<8x32xf32>
    %cst_9 = arith.constant dense<0.000000e+00> : vector<8xf32>
    %15 = vector.multi_reduction <add>, %14, %cst_9 [1] : vector<8x32xf32> to vector<8xf32>
    %16 = vector.shape_cast %15 : vector<8xf32> to vector<8x1xf32>
    %cst_10 = arith.constant 3.200000e+01 : f32
    %17 = vector.broadcast %cst_10 : f32 to vector<8x1xf32>
    %18 = arith.divf %16, %17 : vector<8x1xf32>
    %19 = vector.broadcast %11 : vector<8x1xf32> to vector<8x32xf32>
    %20 = arith.subf %3, %19 : vector<8x32xf32>
    %cst_11 = arith.constant 9.99999974E-6 : f32
    %21 = vector.broadcast %cst_11 : f32 to vector<8x1xf32>
    %22 = arith.addf %18, %21 : vector<8x1xf32>
    %23 = math.rsqrt %22 : vector<8x1xf32>
    %24 = vector.broadcast %23 : vector<8x1xf32> to vector<8x32xf32>
    %25 = arith.mulf %20, %24 : vector<8x32xf32>
    %26 = vector.broadcast %5 : vector<1x32xf32> to vector<8x32xf32>
    %27 = arith.mulf %25, %26 : vector<8x32xf32>
    %28 = vector.broadcast %7 : vector<1x32xf32> to vector<8x32xf32>
    %29 = arith.addf %27, %28 : vector<8x32xf32>
    %30 = arith.truncf %29 : vector<8x32xf32> to vector<8x32xbf16>
    %c0_12 = arith.constant 0 : index
    %c0_13 = arith.constant 0 : index
    %c0_14 = arith.constant 0 : index
    %31 = vector.load %arg5[%c0_12, %c0_13, %c0_14] : memref<1x32x96xbf16, #tpu.memory_space<vmem>>, vector<1x32x96xbf16>
    %32 = vector.shape_cast %31 : vector<1x32x96xbf16> to vector<32x96xbf16>
    %cst_15 = arith.constant dense<0.000000e+00> : vector<8x96xf32>
    %33 = tpu.matmul %30, %32, %cst_15 {dimension_numbers = #tpu.dot_dimension_numbers<[1], [0], [0], [1], [0, 0, 1, 1], [], []>} : vector<8x32xbf16>, vector<32x96xbf16>, vector<8x96xf32> -> vector<8x96xf32>
    %c0_16 = arith.constant 0 : index
    %c0_17 = arith.constant 0 : index
    %c0_18 = arith.constant 0 : index
    %34 = vector.load %arg6[%c0_16, %c0_17, %c0_18] : memref<1x1x96xf32, #tpu.memory_space<vmem>>, vector<1x1x96xf32>
    %35 = vector.shape_cast %34 : vector<1x1x96xf32> to vector<1x96xf32>
    %36 = vector.broadcast %35 : vector<1x96xf32> to vector<8x96xf32>
    %37 = arith.addf %33, %36 : vector<8x96xf32>
    %38 = vector.extract_strided_slice %37 {offsets = [0, 0], sizes = [8, 32], strides = [1, 1]} : vector<8x96xf32> to vector<8x32xf32>
    %39 = vector.extract_strided_slice %38 {offsets = [0, 0], sizes = [8, 16], strides = [1, 1]} : vector<8x32xf32> to vector<8x16xf32>
    %40 = vector.extract_strided_slice %38 {offsets = [0, 16], sizes = [8, 16], strides = [1, 1]} : vector<8x32xf32> to vector<8x16xf32>
    %41 = vector.shape_cast %39 : vector<8x16xf32> to vector<1x8x16xf32>
    %42 = vector.shape_cast %40 : vector<8x16xf32> to vector<1x8x16xf32>
    %43 = tpu.concatenate %41, %42 in 0 : vector<1x8x16xf32>, vector<1x8x16xf32> -> vector<2x8x16xf32>
    %44 = arith.truncf %43 : vector<2x8x16xf32> to vector<2x8x16xbf16>
    %45 = vector.extract_strided_slice %37 {offsets = [0, 32], sizes = [8, 32], strides = [1, 1]} : vector<8x96xf32> to vector<8x32xf32>
    %46 = vector.extract_strided_slice %45 {offsets = [0, 0], sizes = [8, 16], strides = [1, 1]} : vector<8x32xf32> to vector<8x16xf32>
    %47 = vector.extract_strided_slice %45 {offsets = [0, 16], sizes = [8, 16], strides = [1, 1]} : vector<8x32xf32> to vector<8x16xf32>
    %48 = vector.shape_cast %46 : vector<8x16xf32> to vector<1x8x16xf32>
    %49 = vector.shape_cast %47 : vector<8x16xf32> to vector<1x8x16xf32>
    %50 = tpu.concatenate %48, %49 in 0 : vector<1x8x16xf32>, vector<1x8x16xf32> -> vector<2x8x16xf32>
    %51 = arith.truncf %50 : vector<2x8x16xf32> to vector<2x8x16xbf16>
    %52 = vector.extract_strided_slice %37 {offsets = [0, 64], sizes = [8, 32], strides = [1, 1]} : vector<8x96xf32> to vector<8x32xf32>
    %53 = vector.extract_strided_slice %52 {offsets = [0, 0], sizes = [8, 16], strides = [1, 1]} : vector<8x32xf32> to vector<8x16xf32>
    %54 = vector.extract_strided_slice %52 {offsets = [0, 16], sizes = [8, 16], strides = [1, 1]} : vector<8x32xf32> to vector<8x16xf32>
    %55 = vector.shape_cast %53 : vector<8x16xf32> to vector<1x8x16xf32>
    %56 = vector.shape_cast %54 : vector<8x16xf32> to vector<1x8x16xf32>
    %57 = tpu.concatenate %55, %56 in 0 : vector<1x8x16xf32>, vector<1x8x16xf32> -> vector<2x8x16xf32>
    %58 = arith.truncf %57 : vector<2x8x16xf32> to vector<2x8x16xbf16>
    "tpu.trace_start"() <{level = 10 : i32, message = "hqd,hkd->hqk"}> : () -> ()
    %cst_19 = arith.constant dense<0.000000e+00> : vector<2x8x8xf32>
    %59 = tpu.matmul %44, %51, %cst_19 {dimension_numbers = #tpu.dot_dimension_numbers<[2], [2], [1], [1], [0, 0, 0, 1, 1, 1], [0], [0]>} : vector<2x8x16xbf16>, vector<2x8x16xbf16>, vector<2x8x8xf32> -> vector<2x8x8xf32>
    "tpu.trace_stop"() : () -> ()
    %cst_20 = arith.constant 2.500000e-01 : f32
    %60 = vector.broadcast %cst_20 : f32 to vector<2x8x8xf32>
    %61 = arith.mulf %59, %60 : vector<2x8x8xf32>
    %62 = tpu.iota {dimensions = array<i32: 0>} : vector<8x8xi32>
    %63 = tpu.iota {dimensions = array<i32: 1>} : vector<8x8xi32>
    %64 = arith.cmpi sge, %62, %63 : vector<8x8xi32>
    %65 = vector.shape_cast %64 : vector<8x8xi1> to vector<1x8x8xi1>
    %cst_21 = arith.constant -1.000000e+30 : f32
    %66 = vector.shape_cast %65 : vector<1x8x8xi1> to vector<1x8x8xi1>
    %67 = vector.broadcast %66 : vector<1x8x8xi1> to vector<2x8x8xi1>
    %68 = vector.broadcast %cst_21 : f32 to vector<2x8x8xf32>
    %69 = arith.select %67, %61, %68 : vector<2x8x8xi1>, vector<2x8x8xf32>
    %cst_22 = arith.constant dense<0xFF800000> : vector<2x8xf32>
    %70 = vector.multi_reduction <maximumf>, %69, %cst_22 [2] : vector<2x8x8xf32> to vector<2x8xf32>
    %71 = vector.shape_cast %70 : vector<2x8xf32> to vector<2x8x1xf32>
    %72 = vector.broadcast %71 : vector<2x8x1xf32> to vector<2x8x8xf32>
    %73 = arith.subf %69, %72 : vector<2x8x8xf32>
    %74 = math.exp %73 : vector<2x8x8xf32>
    %cst_23 = arith.constant dense<0.000000e+00> : vector<2x8xf32>
    %75 = vector.multi_reduction <add>, %74, %cst_23 [2] : vector<2x8x8xf32> to vector<2x8xf32>
    %76 = vector.shape_cast %75 : vector<2x8xf32> to vector<2x8x1xf32>
    %77 = tpu.reciprocal %76 {approx = true} : vector<2x8x1xf32> -> vector<2x8x1xf32>
    %78 = vector.broadcast %77 : vector<2x8x1xf32> to vector<2x8x8xf32>
    %79 = arith.mulf %74, %78 : vector<2x8x8xf32>
    %80 = arith.truncf %79 : vector<2x8x8xf32> to vector<2x8x8xbf16>
    "tpu.trace_start"() <{level = 10 : i32, message = "hqk,hkd->hqd"}> : () -> ()
    %cst_24 = arith.constant dense<0.000000e+00> : vector<2x8x16xf32>
    %81 = tpu.matmul %80, %58, %cst_24 {dimension_numbers = #tpu.dot_dimension_numbers<[2], [1], [1], [2], [0, 0, 0, 1, 1, 2], [0], [0]>} : vector<2x8x8xbf16>, vector<2x8x16xbf16>, vector<2x8x16xf32> -> vector<2x8x16xf32>
    "tpu.trace_stop"() : () -> ()
    %82 = vector.extract_strided_slice %81 {offsets = [0, 0, 0], sizes = [1, 8, 16], strides = [1, 1, 1]} : vector<2x8x16xf32> to vector<1x8x16xf32>
    %83 = vector.shape_cast %82 : vector<1x8x16xf32> to vector<8x16xf32>
    %84 = vector.extract_strided_slice %81 {offsets = [1, 0, 0], sizes = [1, 8, 16], strides = [1, 1, 1]} : vector<2x8x16xf32> to vector<1x8x16xf32>
    %85 = vector.shape_cast %84 : vector<1x8x16xf32> to vector<8x16xf32>
    %86 = tpu.concatenate %83, %85 in 1 : vector<8x16xf32>, vector<8x16xf32> -> vector<8x32xf32>
    %87 = arith.truncf %86 : vector<8x32xf32> to vector<8x32xbf16>
    %c0_25 = arith.constant 0 : index
    %c0_26 = arith.constant 0 : index
    %c0_27 = arith.constant 0 : index
    %88 = vector.load %arg7[%c0_25, %c0_26, %c0_27] : memref<1x32x32xbf16, #tpu.memory_space<vmem>>, vector<1x32x32xbf16>
    %89 = vector.shape_cast %88 : vector<1x32x32xbf16> to vector<32x32xbf16>
    %cst_28 = arith.constant dense<0.000000e+00> : vector<8x32xf32>
    %90 = tpu.matmul %87, %89, %cst_28 {dimension_numbers = #tpu.dot_dimension_numbers<[1], [0], [0], [1], [0, 0, 1, 1], [], []>} : vector<8x32xbf16>, vector<32x32xbf16>, vector<8x32xf32> -> vector<8x32xf32>
    %c0_29 = arith.constant 0 : index
    %c0_30 = arith.constant 0 : index
    %c0_31 = arith.constant 0 : index
    %91 = vector.load %arg8[%c0_29, %c0_30, %c0_31] : memref<1x1x32xf32, #tpu.memory_space<vmem>>, vector<1x1x32xf32>
    %92 = vector.shape_cast %91 : vector<1x1x32xf32> to vector<1x32xf32>
    %93 = vector.broadcast %92 : vector<1x32xf32> to vector<8x32xf32>
    %94 = arith.addf %90, %93 : vector<8x32xf32>
    %95 = arith.addf %3, %94 : vector<8x32xf32>
    %c0_32 = arith.constant 0 : index
    %c0_33 = arith.constant 0 : index
    %c0_34 = arith.constant 0 : index
    %96 = vector.load %arg9[%c0_32, %c0_33, %c0_34] : memref<1x1x32xf32, #tpu.memory_space<vmem>>, vector<1x1x32xf32>
    %97 = vector.shape_cast %96 : vector<1x1x32xf32> to vector<1x32xf32>
    %c0_35 = arith.constant 0 : index
    %c0_36 = arith.constant 0 : index
    %c0_37 = arith.constant 0 : index
    %98 = vector.load %arg10[%c0_35, %c0_36, %c0_37] : memref<1x1x32xf32, #tpu.memory_space<vmem>>, vector<1x1x32xf32>
    %99 = vector.shape_cast %98 : vector<1x1x32xf32> to vector<1x32xf32>
    %cst_38 = arith.constant dense<0.000000e+00> : vector<8xf32>
    %100 = vector.multi_reduction <add>, %95, %cst_38 [1] : vector<8x32xf32> to vector<8xf32>
    %101 = vector.shape_cast %100 : vector<8xf32> to vector<8x1xf32>
    %cst_39 = arith.constant 3.200000e+01 : f32
    %102 = vector.broadcast %cst_39 : f32 to vector<8x1xf32>
    %103 = arith.divf %101, %102 : vector<8x1xf32>
    %104 = vector.broadcast %103 : vector<8x1xf32> to vector<8x32xf32>
    %105 = arith.subf %95, %104 : vector<8x32xf32>
    %106 = arith.mulf %105, %105 : vector<8x32xf32>
    %cst_40 = arith.constant dense<0.000000e+00> : vector<8xf32>
    %107 = vector.multi_reduction <add>, %106, %cst_40 [1] : vector<8x32xf32> to vector<8xf32>
    %108 = vector.shape_cast %107 : vector<8xf32> to vector<8x1xf32>
    %cst_41 = arith.constant 3.200000e+01 : f32
    %109 = vector.broadcast %cst_41 : f32 to vector<8x1xf32>
    %110 = arith.divf %108, %109 : vector<8x1xf32>
    %111 = vector.broadcast %103 : vector<8x1xf32> to vector<8x32xf32>
    %112 = arith.subf %95, %111 : vector<8x32xf32>
    %cst_42 = arith.constant 9.99999974E-6 : f32
    %113 = vector.broadcast %cst_42 : f32 to vector<8x1xf32>
    %114 = arith.addf %110, %113 : vector<8x1xf32>
    %115 = math.rsqrt %114 : vector<8x1xf32>
    %116 = vector.broadcast %115 : vector<8x1xf32> to vector<8x32xf32>
    %117 = arith.mulf %112, %116 : vector<8x32xf32>
    %118 = vector.broadcast %97 : vector<1x32xf32> to vector<8x32xf32>
    %119 = arith.mulf %117, %118 : vector<8x32xf32>
    %120 = vector.broadcast %99 : vector<1x32xf32> to vector<8x32xf32>
    %121 = arith.addf %119, %120 : vector<8x32xf32>
    %122 = arith.truncf %121 : vector<8x32xf32> to vector<8x32xbf16>
    %c0_43 = arith.constant 0 : index
    %c0_44 = arith.constant 0 : index
    %c0_45 = arith.constant 0 : index
    %123 = vector.load %arg11[%c0_43, %c0_44, %c0_45] : memref<1x32x128xbf16, #tpu.memory_space<vmem>>, vector<1x32x128xbf16>
    %124 = vector.shape_cast %123 : vector<1x32x128xbf16> to vector<32x128xbf16>
    %cst_46 = arith.constant dense<0.000000e+00> : vector<8x128xf32>
    %125 = tpu.matmul %122, %124, %cst_46 {dimension_numbers = #tpu.dot_dimension_numbers<[1], [0], [0], [1], [0, 0, 1, 1], [], []>} : vector<8x32xbf16>, vector<32x128xbf16>, vector<8x128xf32> -> vector<8x128xf32>
    %c0_47 = arith.constant 0 : index
    %c0_48 = arith.constant 0 : index
    %c0_49 = arith.constant 0 : index
    %126 = vector.load %arg12[%c0_47, %c0_48, %c0_49] : memref<1x1x128xf32, #tpu.memory_space<vmem>>, vector<1x1x128xf32>
    %127 = vector.shape_cast %126 : vector<1x1x128xf32> to vector<1x128xf32>
    %128 = vector.broadcast %127 : vector<1x128xf32> to vector<8x128xf32>
    %129 = arith.addf %125, %128 : vector<8x128xf32>
    %cst_50 = arith.constant 5.000000e-01 : f32
    %130 = vector.broadcast %cst_50 : f32 to vector<8x128xf32>
    %131 = arith.mulf %130, %129 : vector<8x128xf32>
    %cst_51 = arith.constant 4.471500e-02 : f32
    %132 = vector.broadcast %cst_51 : f32 to vector<8x128xf32>
    %133 = arith.mulf %132, %129 : vector<8x128xf32>
    %134 = arith.mulf %133, %129 : vector<8x128xf32>
    %135 = arith.mulf %134, %129 : vector<8x128xf32>
    %136 = arith.addf %129, %135 : vector<8x128xf32>
    %cst_52 = arith.constant 0.797884583 : f32
    %137 = vector.broadcast %cst_52 : f32 to vector<8x128xf32>
    %138 = arith.mulf %137, %136 : vector<8x128xf32>
    %139 = math.tanh %138 : vector<8x128xf32>
    %cst_53 = arith.constant 1.000000e+00 : f32
    %140 = vector.broadcast %cst_53 : f32 to vector<8x128xf32>
    %141 = arith.addf %140, %139 : vector<8x128xf32>
    %142 = arith.mulf %131, %141 : vector<8x128xf32>
    %143 = arith.truncf %142 : vector<8x128xf32> to vector<8x128xbf16>
    %c0_54 = arith.constant 0 : index
    %c0_55 = arith.constant 0 : index
    %c0_56 = arith.constant 0 : index
    %144 = vector.load %arg13[%c0_54, %c0_55, %c0_56] : memref<1x128x32xbf16, #tpu.memory_space<vmem>>, vector<1x128x32xbf16>
    %145 = vector.shape_cast %144 : vector<1x128x32xbf16> to vector<128x32xbf16>
    %cst_57 = arith.constant dense<0.000000e+00> : vector<8x32xf32>
    %146 = tpu.matmul %143, %145, %cst_57 {dimension_numbers = #tpu.dot_dimension_numbers<[1], [0], [0], [1], [0, 0, 1, 1], [], []>} : vector<8x128xbf16>, vector<128x32xbf16>, vector<8x32xf32> -> vector<8x32xf32>
    %c0_58 = arith.constant 0 : index
    %c0_59 = arith.constant 0 : index
    %c0_60 = arith.constant 0 : index
    %147 = vector.load %arg14[%c0_58, %c0_59, %c0_60] : memref<1x1x32xf32, #tpu.memory_space<vmem>>, vector<1x1x32xf32>
    %148 = vector.shape_cast %147 : vector<1x1x32xf32> to vector<1x32xf32>
    %149 = vector.broadcast %148 : vector<1x32xf32> to vector<8x32xf32>
    %150 = arith.addf %146, %149 : vector<8x32xf32>
    %151 = arith.addf %95, %150 : vector<8x32xf32>
    %c0_61 = arith.constant 0 : index
    %c0_62 = arith.constant 0 : index
    %152 = vector.load %arg18[%c0_61, %c0_62] : memref<8x32xf32, #tpu.memory_space<vmem>>, vector<8x32xf32>
    tpu.vector_store %arg18[%c0_61, %c0_62], %151 {strides = array<i32>} : memref<8x32xf32, #tpu.memory_space<vmem>>, vector<8x32xf32>,
    %c1_i32 = arith.constant 1 : i32
    %153 = arith.cmpi eq, %arg1, %c1_i32 : i32
    %154 = arith.extui %153 : i1 to i32
    %c0_i32_63 = arith.constant 0 : i32
    %155 = arith.cmpi ne, %154, %c0_i32_63 : i32
    scf.if %155 {
      %c0_64 = arith.constant 0 : index
      %c0_65 = arith.constant 0 : index
      %156 = vector.load %arg15[%c0_64, %c0_65] : memref<1x32xf32, #tpu.memory_space<vmem>>, vector<1x32xf32>
      %c0_66 = arith.constant 0 : index
      %c0_67 = arith.constant 0 : index
      %157 = vector.load %arg16[%c0_66, %c0_67] : memref<1x32xf32, #tpu.memory_space<vmem>>, vector<1x32xf32>
      %cst_68 = arith.constant dense<0.000000e+00> : vector<8xf32>
      %158 = vector.multi_reduction <add>, %151, %cst_68 [1] : vector<8x32xf32> to vector<8xf32>
      %159 = vector.shape_cast %158 : vector<8xf32> to vector<8x1xf32>
      %cst_69 = arith.constant 3.200000e+01 : f32
      %160 = vector.broadcast %cst_69 : f32 to vector<8x1xf32>
      %161 = arith.divf %159, %160 : vector<8x1xf32>
      %162 = vector.broadcast %161 : vector<8x1xf32> to vector<8x32xf32>
      %163 = arith.subf %151, %162 : vector<8x32xf32>
      %164 = arith.mulf %163, %163 : vector<8x32xf32>
      %cst_70 = arith.constant dense<0.000000e+00> : vector<8xf32>
      %165 = vector.multi_reduction <add>, %164, %cst_70 [1] : vector<8x32xf32> to vector<8xf32>
      %166 = vector.shape_cast %165 : vector<8xf32> to vector<8x1xf32>
      %cst_71 = arith.constant 3.200000e+01 : f32
      %167 = vector.broadcast %cst_71 : f32 to vector<8x1xf32>
      %168 = arith.divf %166, %167 : vector<8x1xf32>
      %169 = vector.broadcast %161 : vector<8x1xf32> to vector<8x32xf32>
      %170 = arith.subf %151, %169 : vector<8x32xf32>
      %cst_72 = arith.constant 9.99999974E-6 : f32
      %171 = vector.broadcast %cst_72 : f32 to vector<8x1xf32>
      %172 = arith.addf %168, %171 : vector<8x1xf32>
      %173 = math.rsqrt %172 : vector<8x1xf32>
      %174 = vector.broadcast %173 : vector<8x1xf32> to vector<8x32xf32>
      %175 = arith.mulf %170, %174 : vector<8x32xf32>
      %176 = vector.broadcast %156 : vector<1x32xf32> to vector<8x32xf32>
      %177 = arith.mulf %175, %176 : vector<8x32xf32>
      %178 = vector.broadcast %157 : vector<1x32xf32> to vector<8x32xf32>
      %179 = arith.addf %177, %178 : vector<8x32xf32>
      %c0_73 = arith.constant 0 : index
      %c0_74 = arith.constant 0 : index
      %c0_75 = arith.constant 0 : index
      %180 = vector.load %arg17[%c0_73, %c0_74, %c0_75] : memref<1x8x32xf32, #tpu.memory_space<vmem>>, vector<1x8x32xf32>
      %181 = vector.shape_cast %180 : vector<1x8x32xf32> to vector<8x32xf32>
      %182 = vector.shape_cast %179 : vector<8x32xf32> to vector<1x8x32xf32>
      tpu.vector_store %arg17[%c0_73, %c0_74, %c0_75], %182 {strides = array<i32>} : memref<1x8x32xf32, #tpu.memory_space<vmem>>, vector<1x8x32xf32>,
    } else {
    }
    return
  }
  func.func @transform_0(%arg0: i32, %arg1: i32) -> (i32, i32, i32) {
    %c0_i32 = arith.constant 0 : i32
    %c0_i32_0 = arith.constant 0 : i32
    %c0_i32_1 = arith.constant 0 : i32
    return %arg0, %c0_i32, %c0_i32_0 : i32, i32, i32
  }
  func.func @transform_1(%arg0: i32, %arg1: i32) -> (i32, i32, i32) {
    %c0_i32 = arith.constant 0 : i32
    %c0_i32_0 = arith.constant 0 : i32
    %c0_i32_1 = arith.constant 0 : i32
    return %arg1, %c0_i32, %c0_i32_0 : i32, i32, i32
  }
  func.func @transform_2(%arg0: i32, %arg1: i32) -> (i32, i32, i32) {
    %c0_i32 = arith.constant 0 : i32
    %c0_i32_0 = arith.constant 0 : i32
    %c0_i32_1 = arith.constant 0 : i32
    return %arg1, %c0_i32, %c0_i32_0 : i32, i32, i32
  }
  func.func @transform_3(%arg0: i32, %arg1: i32) -> (i32, i32, i32) {
    %c0_i32 = arith.constant 0 : i32
    %c0_i32_0 = arith.constant 0 : i32
    %c0_i32_1 = arith.constant 0 : i32
    return %arg1, %c0_i32, %c0_i32_0 : i32, i32, i32
  }
  func.func @transform_4(%arg0: i32, %arg1: i32) -> (i32, i32, i32) {
    %c0_i32 = arith.constant 0 : i32
    %c0_i32_0 = arith.constant 0 : i32
    %c0_i32_1 = arith.constant 0 : i32
    return %arg1, %c0_i32, %c0_i32_0 : i32, i32, i32
  }
  func.func @transform_5(%arg0: i32, %arg1: i32) -> (i32, i32, i32) {
    %c0_i32 = arith.constant 0 : i32
    %c0_i32_0 = arith.constant 0 : i32
    %c0_i32_1 = arith.constant 0 : i32
    return %arg1, %c0_i32, %c0_i32_0 : i32, i32, i32
  }
  func.func @transform_6(%arg0: i32, %arg1: i32) -> (i32, i32, i32) {
    %c0_i32 = arith.constant 0 : i32
    %c0_i32_0 = arith.constant 0 : i32
    %c0_i32_1 = arith.constant 0 : i32
    return %arg1, %c0_i32, %c0_i32_0 : i32, i32, i32
  }
  func.func @transform_7(%arg0: i32, %arg1: i32) -> (i32, i32, i32) {
    %c0_i32 = arith.constant 0 : i32
    %c0_i32_0 = arith.constant 0 : i32
    %c0_i32_1 = arith.constant 0 : i32
    return %arg1, %c0_i32, %c0_i32_0 : i32, i32, i32
  }
  func.func @transform_8(%arg0: i32, %arg1: i32) -> (i32, i32, i32) {
    %c0_i32 = arith.constant 0 : i32
    %c0_i32_0 = arith.constant 0 : i32
    %c0_i32_1 = arith.constant 0 : i32
    return %arg1, %c0_i32, %c0_i32_0 : i32, i32, i32
  }
  func.func @transform_9(%arg0: i32, %arg1: i32) -> (i32, i32, i32) {
    %c0_i32 = arith.constant 0 : i32
    %c0_i32_0 = arith.constant 0 : i32
    %c0_i32_1 = arith.constant 0 : i32
    return %arg1, %c0_i32, %c0_i32_0 : i32, i32, i32
  }
  func.func @transform_10(%arg0: i32, %arg1: i32) -> (i32, i32, i32) {
    %c0_i32 = arith.constant 0 : i32
    %c0_i32_0 = arith.constant 0 : i32
    %c0_i32_1 = arith.constant 0 : i32
    return %arg1, %c0_i32, %c0_i32_0 : i32, i32, i32
  }
  func.func @transform_11(%arg0: i32, %arg1: i32) -> (i32, i32, i32) {
    %c0_i32 = arith.constant 0 : i32
    %c0_i32_0 = arith.constant 0 : i32
    %c0_i32_1 = arith.constant 0 : i32
    return %arg1, %c0_i32, %c0_i32_0 : i32, i32, i32
  }
  func.func @transform_12(%arg0: i32, %arg1: i32) -> (i32, i32, i32) {
    %c0_i32 = arith.constant 0 : i32
    %c0_i32_0 = arith.constant 0 : i32
    %c0_i32_1 = arith.constant 0 : i32
    return %arg1, %c0_i32, %c0_i32_0 : i32, i32, i32
  }
  func.func @transform_13(%arg0: i32, %arg1: i32) -> (i32, i32) {
    %c0_i32 = arith.constant 0 : i32
    %c0_i32_0 = arith.constant 0 : i32
    %c0_i32_1 = arith.constant 0 : i32
    return %c0_i32, %c0_i32_0 : i32, i32
  }
  func.func @transform_14(%arg0: i32, %arg1: i32) -> (i32, i32) {
    %c0_i32 = arith.constant 0 : i32
    %c0_i32_0 = arith.constant 0 : i32
    %c0_i32_1 = arith.constant 0 : i32
    return %c0_i32, %c0_i32_0 : i32, i32
  }
  func.func @transform_15(%arg0: i32, %arg1: i32) -> (i32, i32, i32) {
    %c0_i32 = arith.constant 0 : i32
    %c0_i32_0 = arith.constant 0 : i32
    %c0_i32_1 = arith.constant 0 : i32
    return %arg0, %c0_i32, %c0_i32_0 : i32, i32, i32
  }
}

</mosaic_0001>

<bundles_post_ra>
// kernel: gpt_forward.3
= control target key start
LH: loop header
LB: loop body
LE: loop exit
PB: predicated region body
PF: predicated region fallthrough
CT: control target
= control target key end

     0   :  { %v100_v0 = vmov 0.0   ;;  %vm101_vm0 = vmmov 0   ;;  %vm31_vm1 = vcmask 261120   ;;  %s135_s1 = inlined_call_operand.vmem [shape: bf16[32,128], index: 1, kind: input, shape index: {}]   ;;  %s136_s0 = inlined_call_operand.vmem [shape: f32[16,32], index: 0, kind: input, shape index: {}]   ;;  %s137_s2 = inlined_call_operand.vmem [shape: f32[16,128], index: 2, kind: output, shape index: {}]  }
   0x1   :  { %88 = vmatprep.subr.bf16.mxu0 %v100_v0  ;;  %v98_v1 = vld [vmem:[%s135_s1 + $0x8] sm:$0xff]   ;;  %92 = vmatprep.mubr.msk.bf16.mxu0 %vm101_vm0, %v100_v0  ;;  %v99_v2 = vld [vmem:[%s135_s1] sm:$0xff]  }
   0x2   :  { %89 = vmatpush3.bf16.msra.mxu0 %v98_v1  ;;  %v12_v3 = vld [vmem:[%s136_s0] sm:$0xff]  ;;  %v13_v4 = vld [vmem:[%s136_s0 + $0x8] sm:$0xff] }
   0x3   :  { %90 = vmatprep.subr.bf16.mxu0 %v100_v0  ;;  %v14_v5 = vpack.c.bf16 %v13_v4, %v12_v3 }
   0x6   :  { %91 = vmatpush3.bf16.msra.mxu0 %v99_v2 }
   0x9   :  { %93 = vmatmul.mubr.msk.bf16.vlgmr.msra.gmra.mxu0 %vm31_vm1, %v14_v5 }
  0xc9   :  { %v69_v6 = vpop.f32.mrf.mxu0 }
  0xca   :  { %76 = vst [vmem:[%s137_s2] sm:$0xff] %v69_v6 }
  0xcb   :  { %v94_v7 = vpop.f32.mrf.mxu0 }
  0xcd   :  { %v72_v8 = vpop.f32.mrf.mxu0 }
  0xce   :  { %77 = vst [vmem:[%s137_s2 + $0x8] sm:$0xff] %v72_v8 }
  0xcf   :  { %v95_v9 = vpop.f32.mrf.mxu0 }

// kernel: gpt_forward.2
= control target key start
LH: loop header
LB: loop body
LE: loop exit
PB: predicated region body
PF: predicated region fallthrough
CT: control target
= control target key end

     0   :  { %s1899_s18 = smov 0   ;;  %s1901_s19 = smov 0   ;;  %s2141_s0 = inlined_call_operand.vmem [shape: f32[2,8,32], index: 0, kind: input, shape index: {}]   ;;  %s2142_s1 = inlined_call_operand.vmem [shape: f32[2,1,32], index: 1, kind: input, shape index: {}]   ;;  %s2143_s2 = inlined_call_operand.vmem [shape: f32[2,1,32], index: 2, kind: input, shape index: {}]   ;;  %s2144_s3 = inlined_call_operand.vmem [shape: bf16[2,32,96], index: 3, kind: input, shape index: {}]   ;;  %s2145_s4 = inlined_call_operand.vmem [shape: f32[2,1,96], index: 4, kind: input, shape index: {}]   ;;  %s2146_s5 = inlined_call_operand.vmem [shape: bf16[2,32,32], index: 5, kind: input, shape index: {}]   ;;  %s2147_s6 = inlined_call_operand.vmem [shape: f32[2,1,32], index: 6, kind: input, shape index: {}]   ;;  %s2148_s7 = inlined_call_operand.vmem [shape: f32[2,1,32], index: 7, kind: input, shape index: {}]   ;;  %s2149_s8 = inlined_call_operand.vmem [shape: f32[2,1,32], index: 8, kind: input, shape index: {}]   ;;  %s2150_s9 = inlined_call_operand.vmem [shape: bf16[2,32,128], index: 9, kind: input, shape index: {}]   ;;  %s2151_s10 = inlined_call_operand.vmem [shape: f32[2,1,128], index: 10, kind: input, shape index: {}]   ;;  %s2152_s11 = inlined_call_operand.vmem [shape: bf16[2,128,32], index: 11, kind: input, shape index: {}]   ;;  %s2153_s12 = inlined_call_operand.vmem [shape: f32[2,1,32], index: 12, kind: input, shape index: {}]   ;;  %s2154_s13 = inlined_call_operand.vmem [shape: f32[1,32], index: 13, kind: input, shape index: {}]   ;;  %s2155_s14 = inlined_call_operand.vmem [shape: f32[1,32], index: 14, kind: input, shape index: {}]   ;;  %s2156_s15 = inlined_call_operand.vmem [shape: f32[2,8,32], index: 15, kind: output, shape index: {}]  }
   0x1   :  { %2161 = sst [smem:[#allocation9_spill]] %s2141_s0  ;;  %s1903_s20 = smov 0  }
   0x2   :  { %2162 = sst [smem:[#allocation10_spill]] %s2143_s2  ;;  %s1905_s21 = smov 0  }
   0x3   :  { %2163 = sst [smem:[#allocation11_spill]] %s2144_s3  ;;  %s1907_s22 = smov 0  }
   0x4   :  { %2164 = sst [smem:[#allocation12_spill]] %s2146_s5 }
   0x5   :  { %2165 = sst [smem:[#allocation13_spill]] %s2154_s13 }
   0x6   :  { %2166 = sst [smem:[#allocation14_spill]] %s2155_s14 }
   0x7   :  { %2167 = sst [smem:[#allocation15_spill]] %s2156_s15 }
   0x8 LB: > { %2168 = sst [smem:[#allocation3_spill]] %s1795_s18  ;;  %s34_s23 = sadd.s32 1, %s1803_s20  ;;  %s1811_s22 = sphi %s1907_s22, %s25_s22   ;;  %s1807_s21 = sphi %s1905_s21, %s2194_s21   ;;  %s1803_s20 = sphi %s1903_s20, %s2193_s20   ;;  %s1799_s19 = sphi %s1901_s19, %s2192_s19   ;;  %s1795_s18 = sphi %s1899_s18, %s2191_s18  }
   0x9   : > { %2169 = sst [smem:[#allocation4_spill]] %s1803_s20  ;;  %s37_s24 = sadd.s32 1, %s1807_s21 }
   0xa   : > { %2170 = sst [smem:[#allocation5_spill]] %s1807_s21  ;;  %p35_p0 = scmp.ge.s32.totalorder %s34_s23, 2 }
   0xb   : > { %2171 = sst [smem:[#allocation6_spill]] %s1811_s22  ;;  %p1553_p1 = scmp.ge.s32.totalorder %s1811_s22, 1 }
   0xc   : > { %p552_p2 = scmp.lt.s32.totalorder %s1811_s22, 5  ;;  %s2196_s23 = smov (%p35_p0, %s34_s23), 0 }
   0xd   : > { %2172 = sst [smem:[#allocation7_spill]] %s2196_s23  ;;  %s2198_s24 = smov (!%p35_p0, %s37_s24), %s1807_s21 }
   0xe   : > { %p553_p3 = pnand %p1553_p1, %p552_p2  ;;  %p39_p4 = scmp.ge.s32.totalorder %s2198_s24, 2 }
   0xf   : > { %p642_p5 = scmp.lt.s32.totalorder (!%p553_p3), %s1799_s19, 1  ;;  %p646_p6 = scmp.lt.s32.totalorder (!%p553_p3), %s1795_s18, 1 }
  0x10   : > { %s2200_s24 = smov (%p39_p4, %s2198_s24), 0  ;;  %556 = sbr.rel (%p553_p3) target bundleno = 2857 (0xb29), region = 80 }
  0x11   : > { %2173 = sst [smem:[#allocation8_spill]] %s2200_s24 }
  0x12   : > { %s2174_s0 = sld [smem:[#allocation9_spill]] (!%p553_p3) }
  0x13   : > { %s2176_s3 = sld [smem:[#allocation11_spill]] (!%p553_p3) }
  0x14   : > { %s2177_s5 = sld [smem:[#allocation12_spill]] (!%p553_p3) }
  0x15   : > { %s2202_s19 = smov (!%p642_p5, %s1799_s19), 1 }
  0x16   : > { %s1933_s25 = scalar_select %p646_p6, %s1795_s18, 1 }
  0x17   : > { %s1554_s26 = sshll.u32 %s2202_s19, 3 }
  0x18   : > { %s645_s29 = scalar_lea.vmem %s2174_s0, %s1554_s26  ;;  %s1599_s20 = sshll.u32 %s1933_s25, 4 }
  0x19   : > { %s1950_s13 = scalar_lea.vmem %s2176_s3, %s1599_s20  ;;  %s1976_s19 = scalar_lea.vmem %s2150_s9, %s1599_s20 }
  0x1a   : > { %s1959_s0 = scalar_lea.vmem %s2177_s5, %s1599_s20  ;;  %s681_s15 = scalar_lea.vmem %s2151_s10, %s1933_s25 }
  0x1b   : > { %s1602_s5 = sshll.u32 %s1933_s25, 6  ;;  %s689_s23 = scalar_lea.vmem %s2153_s12, %s1933_s25 }
  0x1c   : > { %s1990_s17 = scalar_lea.vmem %s2152_s11, %s1602_s5  ;;  %s2178_s3 = sld [smem:[#allocation15_spill]] }
  0x1d   : > { %s2179_s20 = sld [smem:[#allocation3_spill]] }
  0x22   : > { %s1995_s2 = scalar_lea.vmem %s2178_s3, %s1554_s26 }
  0x23   : > { %p1564_p7 = scmp.ne.s32.totalorder %s2179_s20, 0 }
  0x25   : > { %698 = sbr.rel (%p1564_p7) target bundleno = 44 (0x2c), region = 84 }
  0x2a   : > { %v699_v0 = vld [vmem:[%s645_s29] sm:$0xff]  ;;  %vm700_vm0 = vcmask 261120  }
  0x2b   : > { %701 = vst.msk [vmem:[#allocation2] sm:$0xff] %vm700_vm0, %v699_v0 }
  0x2c PF: > { %vm705_vm1 = vcmask 261120   ;;  %v1743_v8 = vld [vmem:[%s1950_s13 + $0x8] sm:$0xff]   ;;  %v1813_v9 = vmov 0.0   ;;  %vm1814_vm2 = vmmov 0   ;;  %v1744_v10 = vld [vmem:[%s1950_s13] sm:$0xff]   ;;  %s2180_s13 = scalar_lea.vmem %s2142_s1, %s1933_s25  ;;  %s2181_s18 = sld [smem:[#allocation10_spill]]  ;;  %v908_v34 = vlaneseq }
  0x2d   : > { %1629 = vmatprep.subr.bf16.mxu0 %v1813_v9  ;;  %1633 = vmatprep.mubr.msk.bf16.mxu0 %vm1814_vm2, %v1813_v9  ;;  %v1565_v15 = vld [vmem:[%s2180_s13] ss:$0 sm:$0xff]  ;;  %s2183_s16 = scalar_lea.vmem %s2145_s4, %s1933_s25  ;;  %s1815_s21 = smov 112   ;;  %vm810_vm3 = vcmask 130048   ;;  %vm917_vm5 = vcmask 64512   ;;  %vm947_vm6 = vcmask 1043456  }
  0x2e   : > { %1630 = vmatpush3.bf16.msra.mxu0 %v1743_v8  ;;  %1649 = vmatprep.subr.bf16.mxu1 %v1813_v9  ;;  %v1567_v21 = vld [vmem:[%s2183_s16] ss:$0 sm:$0xff]  ;;  %s1816_s24 = smov 96   ;;  %v909_v35 = vshrl.u32 %v908_v34, 7  ;;  %v911_v36 = vand.u32 127, %v908_v34  ;;  %s1817_s14 = smov 64  }
  0x2f   : > { %1631 = vmatprep.subr.bf16.mxu0 %v1813_v9  ;;  %1651 = vmatprep.mubr.msk.bf16.mxu1 %vm1814_vm2, %v1813_v9  ;;  %s1818_s22 = smov 16   ;;  %s2184_s3 = scalar_lea.vmem %s2147_s6, %s1933_s25 }
  0x30   : > { %vm912_vm4 = vcmp.ge.s32.totalorder %v909_v35, %v911_v36  ;;  %s2185_s26 = scalar_lea.vmem %s2148_s7, %s1933_s25  ;;  %s2187_s30 = sld [smem:[#allocation3_spill]] }
  0x32   : > { %v1998_v1 = vld [vmem:[#allocation2] sm:$0xff]  ;;  %1632 = vmatpush3.bf16.msra.mxu0 %v1744_v10  ;;  %s2182_s27 = scalar_lea.vmem %s2181_s18, %s1933_s25 }
  0x33   : > { %v706_v2 = vsel %vm705_vm1, %v1998_v1, 0.0  ;;  %1637 = vmatprep.subr.bf16.mxu0 %v1813_v9  ;;  %v1566_v17 = vld [vmem:[%s2182_s27] ss:$0 sm:$0xff] }
  0x34   : > { %707 = vadd.xlane.f32.xlu0 %v706_v2 }
  0x36   : > { %p1594_p8 = scmp.ne.s32.totalorder %s2187_s30, 1 }
  0x37   : > { %s2188_s16 = sld [smem:[#allocation13_spill]] (!%p1594_p8) }
  0xbd   : > { %v708_v3 = vpop.xlane.xlu0 %707 }
  0xbe   : > { %v710_v4 = vmul.f32 0.03125, %v708_v3 }
  0xc0   : > { %v711_v5 = vsub.f32 %v1998_v1, %v710_v4 }
  0xc2   : > { %v712_v6 = vmul.f32 %v711_v5, %v711_v5 }
  0xc4   : > { %v713_v7 = vsel %vm705_vm1, %v712_v6, 0.0 }
  0xc5   : > { %714 = vadd.xlane.f32.xlu0 %v713_v7 }
 0x14e   : > { %v715_v11 = vpop.xlane.xlu0 %714 }
 0x14f   : > { %v716_v12 = vmul.f32 0.03125, %v715_v11  ;;  %v1745_v11 = vld [vmem:[%s1959_s0 + $0x8] sm:$0xff]  }
 0x151   : > { %v717_v13 = vadd.f32 1e-05, %v716_v12 }
 0x153   : > { %1757 = vrsqrt.f32 %v717_v13 }
 0x160   : > { %v1758_v14 = vpop.eup %1757 }
 0x161   : > { %v719_v16 = vmul.f32 %v1758_v14, %v711_v5 }
 0x163   : > { %v726_v18 = vmul.f32 %v1565_v15, %v719_v16  ;;  %v1746_v16 = vld [vmem:[%s1959_s0] sm:$0xff]  }
 0x165   : > { %v733_v19 = vadd.f32 %v1566_v17, %v726_v18 }
 0x167   : > { %v734_v20 = vpack.c.bf16 %v733_v19, %v733_v19 }
 0x169   : > { %1634 = vmatmul.mubr.msk.bf16.vlgmr.msra.gmra.mxu0 %vm705_vm1, %v734_v20 }
 0x16a   : > { %1639 = vmatprep.mubr.msk.bf16.mxu0 %vm1814_vm2, %v1813_v9 }
 0x229   : > { %v795_v22 = vpop.f32.mrf.mxu0 }
 0x22a   : > { %v796_v23 = vadd.f32 %v1567_v21, %v795_v22 }
 0x22b   : > { %v1635_v24 = vpop.f32.mrf.mxu0 }
 0x22c   : > { %802 = vrot.lane.b32.xlu1 %v796_v23, %s1815_s21  ;;  %v805_v26 = vpack.c.bf16 %v796_v23, %v796_v23  ;;  %v1575_v24 = vld [vmem:[%s2184_s3] ss:$0 sm:$0xff] }
 0x22d   : > { %v798_v25 = vpop.f32.mrf.mxu0 }
 0x22f   : > { %v1636_v27 = vpop.f32.mrf.mxu0 }
 0x230   : > { %808 = vrot.lane.b32.xlu1 %v805_v26, %s1816_s24 }
 0x29e   : > { %v803_v28 = vpop.permute.xlu1 %802 }
 0x29f   : > { %v806_v29 = vpack.c.bf16 %v803_v28, %v803_v28 }
 0x2a1   : > { %858 = vrot.lane.b32.xlu0 %v806_v29, %s1816_s24 }
 0x2a2   : > { %v809_v30 = vpop.permute.xlu1 %808 }
 0x2a3   : > { %v815_v31 = vsel %vm810_vm3, %v809_v30, 0 }
 0x2a4   : > { %1638 = vmatpush3.bf16.xpose.msra.mxu0 %v815_v31 }
 0x2a5   : > { %1643 = vmatprep.subr.bf16.mxu0 %v1813_v9 }
 0x2ab   : > { %1640 = vmatmul.mubr.msk.bf16.vlgmr.msra.gmra.mxu0 %vm810_vm3, %v805_v26 }
 0x2ac   : > { %1645 = vmatprep.mubr.msk.bf16.mxu0 %vm1814_vm2, %v1813_v9 }
 0x313   : > { %v859_v32 = vpop.permute.xlu0 %858 }
 0x314   : > { %v864_v33 = vsel %vm810_vm3, %v859_v32, 0 }
 0x315   : > { %1644 = vmatpush3.bf16.xpose.msra.mxu0 %v864_v33 }
 0x316   : > { %1655 = vmatprep.subr.bf16.mxu0 %v1813_v9 }
 0x31c   : > { %1646 = vmatmul.mubr.msk.bf16.vlgmr.msra.gmra.mxu0 %vm810_vm3, %v806_v29 }
 0x31d   : > { %1657 = vmatprep.mubr.msk.bf16.mxu0 %vm1814_vm2, %v1813_v9 }
 0x36b   : > { %v851_v37 = vpop.f32.mrf.mxu0 }
 0x36c   : > { %v906_v38 = vmul.f32 0.25, %v851_v37  ;;  %v1747_v37 = vld [vmem:[%s1976_s19 + $0x8] sm:$0xff]  }
 0x36d   : > { %v1641_v39 = vpop.f32.mrf.mxu0 }
 0x36e   : > { %v915_v40 = vsel %vm912_vm4, %v906_v38, -1e+30 }
 0x36f   : > { %v854_v41 = vpop.f32.mrf.mxu0  ;;  %v918_v42 = vsel %vm917_vm5, %v915_v40, -inf }
 0x370   : > { %919 = vmax.xlane.f32.xlu0 %v918_v42  ;;  %v1579_v42 = vld [vmem:[%s2185_s26] ss:$0 sm:$0xff] }
 0x371   : > { %v1642_v43 = vpop.f32.mrf.mxu0 }
 0x3dc   : > { %v900_v44 = vpop.f32.mrf.mxu0 }
 0x3dd   : > { %v907_v45 = vmul.f32 0.25, %v900_v44 }
 0x3de   : > { %v1647_v46 = vpop.f32.mrf.mxu0 }
 0x3df   : > { %v916_v47 = vsel %vm912_vm4, %v907_v45, -1e+30 }
 0x3e0   : > { %v903_v48 = vpop.f32.mrf.mxu0  ;;  %v921_v49 = vsel %vm917_vm5, %v916_v47, -inf }
 0x3e1   : > { %922 = vmax.xlane.f32.xlu1 %v921_v49  ;;  %v1749_v48 = vld [vmem:[%s1990_s17 + $0x38] sm:$0xff]   ;;  %v1750_v49 = vld [vmem:[%s1990_s17 + $0x30] sm:$0xff]  }
 0x3e2   : > { %v1648_v50 = vpop.f32.mrf.mxu0 }
 0x3e3   : > { %v1751_v50 = vld [vmem:[%s1990_s17 + $0x28] sm:$0xff]  }
 0x3f9   : > { %v920_v51 = vpop.xlane.xlu0 %919 }
 0x3fa   : > { %v924_v52 = vsub.f32 %v915_v40, %v920_v51  ;;  %v1752_v51 = vld [vmem:[%s1990_s17 + $0x20] sm:$0xff]  }
 0x3fc   : > { %v926_v53 = vmul.f32 1.442695, %v924_v52  ;;  %v1753_v52 = vld [vmem:[%s1990_s17 + $0x18] sm:$0xff]  }
 0x3fe   : > { %1759 = vpow2.f32 %v926_v53  ;;  %v1754_v53 = vld [vmem:[%s1990_s17 + $0x10] sm:$0xff]  }
 0x40b   : > { %v1760_v54 = vpop.eup %1759 }
 0x40c   : > { %v930_v55 = vsel %vm917_vm5, %v1760_v54, 0.0 }
 0x40d   : > { %931 = vadd.xlane.f32.xlu0 %v930_v55  ;;  %v1756_v55 = vld [vmem:[%s1990_s17] sm:$0xff]  }
 0x423   : > { %942 = vrot.lane.b32.xlu0 %v805_v26, %s1817_s14 }
 0x46a   : > { %v923_v56 = vpop.xlane.xlu1 %922 }
 0x46b   : > { %v925_v57 = vsub.f32 %v916_v47, %v923_v56  ;;  %v1581_v56 = vld [vmem:[%s681_s15] ss:$0 sm:$0xff] }
 0x46d   : > { %v928_v58 = vmul.f32 1.442695, %v925_v57 }
 0x46f   : > { %1761 = vpow2.f32 %v928_v58 }
 0x47c   : > { %v1762_v59 = vpop.eup %1761 }
 0x47d   : > { %v933_v60 = vsel %vm917_vm5, %v1762_v59, 0.0 }
 0x47e   : > { %934 = vadd.xlane.f32.xlu1 %v933_v60 }
 0x48f   : > { %991 = vrot.lane.b32.xlu1 %v806_v29, %s1817_s14  ;;  %s2189_s14 = sld [smem:[#allocation14_spill]] (!%p1594_p8) }
 0x496   : > { %v932_v61 = vpop.xlane.xlu0 %931 }
 0x497   : > { %1763 = vrcp.f32 %v932_v61 }
 0x49a   : > { %v943_v62 = vpop.permute.xlu0 %942 }
 0x49b   : > { %v949_v63 = vsel %vm947_vm6, %v943_v62, 0 }
 0x49c   : > { %1650 = vmatpush3.bf16.msra.mxu1 %v949_v63 }
 0x49d   : > { %1661 = vmatprep.subr.bf16.mxu1 %v1813_v9 }
 0x4a4   : > { %v1764_v0 = vpop.eup %1763 }
 0x4a5   : > { %v938_v2 = vmul.f32 %v1764_v0, %v1760_v54  ;;  %v1755_v54 = vld [vmem:[%s1990_s17 + $0x8] sm:$0xff]  }
 0x4a7   : > { %v940_v3 = vpack.c.bf16 %v938_v2, %v938_v2 }
 0x4a9   : > { %1652 = vmatmul.mubr.msk.bf16.vlgmr.msra.gmra.mxu1 %vm917_vm5, %v940_v3 }
 0x4aa   : > { %1665 = vmatprep.mubr.msk.bf16.mxu1 %vm1814_vm2, %v1813_v9  ;;  %1662 = vmatpush3.bf16.msra.mxu1 %v1745_v11 }
 0x4ab   : > { %1663 = vmatprep.subr.bf16.mxu1 %v1813_v9 }
 0x4ae   : > { %1664 = vmatpush3.bf16.msra.mxu1 %v1746_v16 }
 0x4af   : > { %1677 = vmatprep.subr.bf16.mxu1 %v1813_v9 }
 0x507   : > { %v935_v4 = vpop.xlane.xlu1 %934 }
 0x508   : > { %1765 = vrcp.f32 %v935_v4 }
 0x50b   : > { %v992_v5 = vpop.permute.xlu1 %991 }
 0x50c   : > { %v997_v6 = vsel %vm947_vm6, %v992_v5, 0 }
 0x50d   : > { %1656 = vmatpush3.bf16.msra.mxu0 %v997_v6 }
 0x50e   : > { %1669 = vmatprep.subr.bf16.mxu0 %v1813_v9 }
 0x515   : > { %v1766_v7 = vpop.eup %1765 }
 0x516   : > { %v939_v8 = vmul.f32 %v1766_v7, %v1762_v59 }
 0x518   : > { %v941_v10 = vpack.c.bf16 %v939_v8, %v939_v8  ;;  %v1585_v8 = vld [vmem:[%s689_s23] ss:$0 sm:$0xff] }
 0x51a   : > { %1658 = vmatmul.mubr.msk.bf16.vlgmr.msra.gmra.mxu0 %vm917_vm5, %v941_v10 }
 0x51b   : > { %1673 = vmatprep.mubr.msk.bf16.mxu0 %vm1814_vm2, %v1813_v9  ;;  %1670 = vmatpush3.bf16.msra.mxu0 %v1747_v37 }
 0x51c   : > { %1671 = vmatprep.subr.bf16.mxu0 %v1813_v9 }
 0x569   : > { %v985_v12 = vpop.f32.mrf.mxu1 }
 0x56b   : > { %v1653_v13 = vpop.f32.mrf.mxu1 }
 0x56d   : > { %v988_v14 = vpop.f32.mrf.mxu1 }
 0x56f   : > { %v1654_v15 = vpop.f32.mrf.mxu1 }
 0x5da   : > { %v1033_v17 = vpop.f32.mrf.mxu0 }
 0x5db   : > { %1040 = vrot.lane.b32.xlu1 %v1033_v17, %s1818_s22 }
 0x5dc   : > { %v1659_v18 = vpop.f32.mrf.mxu0 }
 0x5de   : > { %v1036_v19 = vpop.f32.mrf.mxu0 }
 0x5e0   : > { %v1660_v20 = vpop.f32.mrf.mxu0 }
 0x64d   : > { %v1041_v21 = vpop.permute.xlu1 %1040 }
 0x64e   : > { %v1043_v22 = vsel %vm810_vm3, %v985_v12, %v1041_v21 }
 0x64f   : > { %v1044_v23 = vpack.c.bf16 %v1043_v22, %v1043_v22 }
 0x651   : > { %1666 = vmatmul.mubr.msk.bf16.vlgmr.msra.gmra.mxu1 %vm705_vm1, %v1044_v23 }
 0x652   : > { %1693 = vmatprep.mubr.msk.bf16.mxu1 %vm1814_vm2, %v1813_v9  ;;  %1678 = vmatpush3.bf16.msra.mxu1 %v1749_v48 }
 0x653   : > { %1679 = vmatprep.subr.bf16.mxu1 %v1813_v9 }
 0x656   : > { %1680 = vmatpush3.bf16.msra.mxu1 %v1750_v49 }
 0x657   : > { %1681 = vmatprep.subr.bf16.mxu1 %v1813_v9 }
 0x65a   : > { %1682 = vmatpush3.bf16.msra.mxu1 %v1751_v50 }
 0x65b   : > { %1683 = vmatprep.subr.bf16.mxu1 %v1813_v9 }
 0x65e   : > { %1684 = vmatpush3.bf16.msra.mxu1 %v1752_v51 }
 0x65f   : > { %1685 = vmatprep.subr.bf16.mxu1 %v1813_v9 }
 0x662   : > { %1686 = vmatpush3.bf16.msra.mxu1 %v1753_v52 }
 0x663   : > { %1687 = vmatprep.subr.bf16.mxu1 %v1813_v9 }
 0x666   : > { %1688 = vmatpush3.bf16.msra.mxu1 %v1754_v53 }
 0x667   : > { %1689 = vmatprep.subr.bf16.mxu1 %v1813_v9 }
 0x66a   : > { %1690 = vmatpush3.bf16.msra.mxu1 %v1755_v54 }
 0x66b   : > { %1691 = vmatprep.subr.bf16.mxu1 %v1813_v9 }
 0x66e   : > { %1692 = vmatpush3.bf16.msra.mxu1 %v1756_v55 }
 0x711   : > { %v1105_v25 = vpop.f32.mrf.mxu1 }
 0x712   : > { %v1106_v26 = vadd.f32 %v1575_v24, %v1105_v25 }
 0x713   : > { %v1667_v27 = vpop.f32.mrf.mxu1 }
 0x714   : > { %v2068_v28 = vadd.f32 %v1106_v26, %v1998_v1  ;;  %v1748_v1 = vld [vmem:[%s1976_s19] sm:$0xff]   ;;  %s2186_s19 = scalar_lea.vmem %s2149_s8, %s1933_s25 }
 0x715   : > { %v1108_v29 = vpop.f32.mrf.mxu1  ;;  %1672 = vmatpush3.bf16.msra.mxu0 %v1748_v1  ;;  %v1580_v44 = vld [vmem:[%s2186_s19] ss:$0 sm:$0xff] }
 0x716   : > { %v1114_v30 = vsel %vm705_vm1, %v2068_v28, 0.0 }
 0x717   : > { %1115 = vadd.xlane.f32.xlu1 %v1114_v30  ;;  %v1668_v31 = vpop.f32.mrf.mxu1 }
 0x7a0   : > { %v1116_v32 = vpop.xlane.xlu1 %1115 }
 0x7a1   : > { %v1117_v33 = vmul.f32 0.03125, %v1116_v32 }
 0x7a3   : > { %v1118_v34 = vsub.f32 %v2068_v28, %v1117_v33 }
 0x7a5   : > { %v1119_v35 = vmul.f32 %v1118_v34, %v1118_v34 }
 0x7a7   : > { %v1120_v36 = vsel %vm705_vm1, %v1119_v35, 0.0 }
 0x7a8   : > { %1121 = vadd.xlane.f32.xlu0 %v1120_v36 }
 0x831   : > { %v1122_v38 = vpop.xlane.xlu0 %1121 }
 0x832   : > { %v1123_v39 = vmul.f32 0.03125, %v1122_v38 }
 0x834   : > { %v1124_v40 = vadd.f32 1e-05, %v1123_v39 }
 0x836   : > { %1767 = vrsqrt.f32 %v1124_v40 }
 0x843   : > { %v1768_v41 = vpop.eup %1767 }
 0x844   : > { %v1126_v43 = vmul.f32 %v1768_v41, %v1118_v34 }
 0x846   : > { %v1133_v45 = vmul.f32 %v1579_v42, %v1126_v43 }
 0x848   : > { %v1140_v46 = vadd.f32 %v1580_v44, %v1133_v45 }
 0x84a   : > { %v1141_v47 = vpack.c.bf16 %v1140_v46, %v1140_v46 }
 0x84c   : > { %1674 = vmatmul.mubr.msk.bf16.vlgmr.msra.gmra.mxu0 %vm705_vm1, %v1141_v47 }
 0x90c   : > { %v1202_v57 = vpop.f32.mrf.mxu0 }
 0x90d   : > { %v1203_v58 = vadd.f32 %v1581_v56, %v1202_v57 }
 0x90e   : > { %v1675_v59 = vpop.f32.mrf.mxu0 }
 0x90f   : > { %v1209_v60 = vmul.f32 0.044715, %v1203_v58  ;;  %v1208_v9 = vmul.f32 0.5, %v1203_v58 }
 0x910   : > { %v1205_v61 = vpop.f32.mrf.mxu0 }
 0x911   : > { %v1210_v62 = vmul.f32 %v1209_v60, %v1203_v58 }
 0x912   : > { %v1676_v63 = vpop.f32.mrf.mxu0 }
 0x913   : > { %v1211_v0 = vmul.f32 %v1210_v62, %v1203_v58 }
 0x915   : > { %v1212_v2 = vadd.f32 %v1211_v0, %v1203_v58 }
 0x917   : > { %v1213_v3 = vmul.f32 0.7978846, %v1212_v2 }
 0x919   : > { %1769 = vtanh.f32 %v1213_v3 }
 0x926   : > { %v1770_v4 = vpop.eup %1769 }
 0x927   : > { %v1215_v5 = vadd.f32 1.0, %v1770_v4 }
 0x929   : > { %v1216_v6 = vmul.f32 %v1215_v5, %v1208_v9 }
 0x92b   : > { %v1217_v7 = vpack.c.bf16 %v1216_v6, %v1216_v6 }
 0x92d   : > { %1694 = vmatmul.mubr.bf16.vlgmr.msra.gmra.mxu1 %v1217_v7 }
 0x9ed   : > { %v1323_v10 = vpop.f32.mrf.mxu1 }
 0x9ee   : > { %v1324_v11 = vadd.f32 %v1585_v8, %v1323_v10 }
 0x9ef   : > { %v1695_v12 = vpop.f32.mrf.mxu1  ;;  %1334 = sbr.rel (%p1594_p8) target bundleno = 2857 (0xb29), region = 88 }
 0x9f0   : > { %v1329_v13 = vadd.f32 %v1324_v11, %v2068_v28 }
 0x9f1   : > { %v1326_v14 = vpop.f32.mrf.mxu1 }
 0x9f2   : > { %1330 = vst.msk [vmem:[#allocation2] sm:$0xff] %vm705_vm1, %v1329_v13 }
 0x9f3   : > { %v1696_v15 = vpop.f32.mrf.mxu1 }
 0x9f4   : > { %v1337_v16 = vsel %vm705_vm1, %v1329_v13, 0.0  ;;  %v1595_v26 = vld [vmem:[%s2188_s16] ss:$0 sm:$0xff] }
 0x9f5   : > { %1338 = vadd.xlane.f32.xlu0 %v1337_v16  ;;  %v1596_v28 = vld [vmem:[%s2189_s14] ss:$0 sm:$0xff] }
 0xa7e   : > { %v1339_v17 = vpop.xlane.xlu0 %1338 }
 0xa7f   : > { %v1340_v18 = vmul.f32 0.03125, %v1339_v17 }
 0xa81   : > { %v1341_v19 = vsub.f32 %v1329_v13, %v1340_v18 }
 0xa83   : > { %v1342_v20 = vmul.f32 %v1341_v19, %v1341_v19 }
 0xa85   : > { %v1343_v21 = vsel %vm705_vm1, %v1342_v20, 0.0 }
 0xa86   : > { %1344 = vadd.xlane.f32.xlu0 %v1343_v21 }
 0xb0f   : > { %v1345_v22 = vpop.xlane.xlu0 %1344 }
 0xb10   : > { %v1346_v23 = vmul.f32 0.03125, %v1345_v22 }
 0xb12   : > { %v1347_v24 = vadd.f32 1e-05, %v1346_v23 }
 0xb14   : > { %1771 = vrsqrt.f32 %v1347_v24 }
 0xb21   : > { %v1772_v25 = vpop.eup %1771 }
 0xb22   : > { %v1349_v27 = vmul.f32 %v1772_v25, %v1341_v19 }
 0xb24   : > { %v1356_v29 = vmul.f32 %v1595_v26, %v1349_v27 }
 0xb26   : > { %v1363_v30 = vadd.f32 %v1596_v28, %v1356_v29 }
 0xb28   : > { %1364 = vst.msk [vmem:[%s1995_s2] sm:$0xff] %vm705_vm1, %v1363_v30 }
 0xb29 PF: > { %s2190_s22 = sld [smem:[#allocation6_spill]] }
 0xb2a   : > { %s2191_s18 = sld [smem:[#allocation4_spill]] }
 0xb2b   : > { %s2192_s19 = sld [smem:[#allocation5_spill]] }
 0xb2c   : > { %s2193_s20 = sld [smem:[#allocation7_spill]] }
 0xb2d   : > { %s2194_s21 = sld [smem:[#allocation8_spill]] }
 0xb2f   : > { %s25_s22 = sadd.s32 1, %s2190_s22  }
 0xb30   : > { %p22_p9 = scmp.ge.s32.totalorder %s25_s22, 6  }
 0xb32   :  { %24 = sbr.rel (!%p22_p9) target bundleno = 8 (0x8), region = 154 }

</bundles_post_ra>
